<compile_context>
chip_gen: v7x
topology: tpu7x:2x2x1
jax: 0.10.0
libtpu: 0.0.40
codegen_flags: <defaults>
</compile_context>

<pallas_src>
import functools

import jax
import jax.numpy as jnp
from jax.experimental import pallas as pl
from jax.experimental.pallas import tpu as pltpu

_COMPUTE_DTYPE = jnp.bfloat16   # MXU operand dtype (accumulation stays f32)


# ----------------------------------------------------------------------------
# Pallas kernels
# ----------------------------------------------------------------------------
def _matmul_ln_relu_kernel(x_ref, w_ref, g_ref, b_ref, o_ref, *, eps, inv_c):
    """Fused conv-as-matmul + LayerNorm(channels) + ReLU on one HW tile.

    x_ref: (K, T)     bf16  im2col columns (K = 9*Cin, T = HW tile on lanes)
    w_ref: (Cout, K)  bf16  folded conv weights
    g_ref: (Cout, 1)  f32   LN gamma
    b_ref: (Cout, 1)  f32   LN beta
    o_ref: (Cout, T)        output tile (lane-dense)
    """
    y = jnp.dot(w_ref[...], x_ref[...],
                preferred_element_type=jnp.float32)            # (Cout, T) f32
    # Single-pass LayerNorm statistics over the channel (sublane) axis.
    s1 = jnp.sum(y, axis=0, keepdims=True)                     # (1, T)
    s2 = jnp.sum(y * y, axis=0, keepdims=True)                 # (1, T)
    mean = s1 * inv_c
    var = s2 * inv_c - mean * mean
    yn = (y - mean) * jax.lax.rsqrt(var + eps)
    yn = yn * g_ref[...] + b_ref[...]
    o_ref[...] = jnp.maximum(yn, 0.0).astype(o_ref.dtype)


def _matmul_bias_kernel(x_ref, w_ref, b_ref, o_ref):
    """1x1 conv with bias on one HW tile: (Cout, Cin) @ (Cin, T) + b."""
    y = jnp.dot(w_ref[...], x_ref[...], preferred_element_type=jnp.float32)
    o_ref[...] = (y + b_ref[...]).astype(o_ref.dtype)


# ----------------------------------------------------------------------------
# Wrappers around pallas_call
# ----------------------------------------------------------------------------
_CPARAMS = pltpu.CompilerParams(
    dimension_semantics=("parallel", "parallel"),
    vmem_limit_bytes=48 * 1024 * 1024,
)


def _pick_hw_tile(hw, cap=4096):
    """Largest lane tile <= cap that divides hw and is a multiple of 128.

    Falls back to the full extent (always a legal block shape)."""
    if hw <= cap:
        return hw
    best = hw
    if hw % 128 == 0:
        for cand in range(128, cap + 1, 128):
            if hw % cand == 0:
                best = cand
    return best


def _im2col_nchw(x):
    """x: (N, C, H, W) -> (N, 9*C, H*W); row index = (ky*3+kx)*C + c (pad=1)."""
    n, c, h, w = x.shape
    xp = jnp.pad(x, ((0, 0), (0, 0), (1, 1), (1, 1)))
    taps = [xp[:, :, ky:ky + h, kx:kx + w] for ky in range(3) for kx in range(3)]
    col = jnp.stack(taps, axis=1)                     # (N, 9, C, H, W)
    return col.reshape(n, 9 * c, h * w)


def conv3x3_ln_relu(x, w, gamma, beta, eps=1e-5, out_dtype=_COMPUTE_DTYPE):
    """x: (N, Cin, H, W); w: (Cout, Cin, 3, 3) PyTorch layout; gamma/beta: (Cout,)."""
    n, cin, h, wd = x.shape
    cout = w.shape[0]
    hw = h * wd
    k = 9 * cin

    x_col = _im2col_nchw(x.astype(_COMPUTE_DTYPE))                      # (N, 9*Cin, HW)
    wk = jnp.transpose(w, (0, 2, 3, 1)).reshape(cout, k).astype(_COMPUTE_DTYPE)
    g2 = gamma.reshape(cout, 1).astype(jnp.float32)
    b2 = beta.reshape(cout, 1).astype(jnp.float32)

    t = _pick_hw_tile(hw)
    kernel = functools.partial(_matmul_ln_relu_kernel, eps=eps, inv_c=1.0 / cout)
    out = pl.pallas_call(
        kernel,
        out_shape=jax.ShapeDtypeStruct((n, cout, hw), out_dtype),
        grid=(n, hw // t),
        in_specs=[
            pl.BlockSpec((None, k, t), lambda i, j: (i, 0, j)),
            pl.BlockSpec((cout, k), lambda i, j: (0, 0)),
            pl.BlockSpec((cout, 1), lambda i, j: (0, 0)),
            pl.BlockSpec((cout, 1), lambda i, j: (0, 0)),
        ],
        out_specs=pl.BlockSpec((None, cout, t), lambda i, j: (i, 0, j)),
        compiler_params=_CPARAMS,
    )(x_col, wk, g2, b2)
    return out.reshape(n, cout, h, wd)


def conv1x1_bias(x, w, b, out_dtype=jnp.float32):
    """x: (N, Cin, H, W); w: (Cout, Cin, 1, 1) PyTorch layout; b: (Cout,)."""
    n, cin, h, wd = x.shape
    cout = w.shape[0]
    hw = h * wd

    xm = x.reshape(n, cin, hw).astype(_COMPUTE_DTYPE)
    wm = w.reshape(cout, cin).astype(_COMPUTE_DTYPE)
    b2 = b.reshape(cout, 1).astype(jnp.float32)

    t = _pick_hw_tile(hw)
    out = pl.pallas_call(
        _matmul_bias_kernel,
        out_shape=jax.ShapeDtypeStruct((n, cout, hw), out_dtype),
        grid=(n, hw // t),
        in_specs=[
            pl.BlockSpec((None, cin, t), lambda i, j: (i, 0, j)),
            pl.BlockSpec((cout, cin), lambda i, j: (0, 0)),
            pl.BlockSpec((cout, 1), lambda i, j: (0, 0)),
        ],
        out_specs=pl.BlockSpec((None, cout, t), lambda i, j: (i, 0, j)),
        compiler_params=_CPARAMS,
    )(xm, wm, b2)
    return out.reshape(n, cout, h, wd)


# ----------------------------------------------------------------------------
# aligned_bilinear (exact semantics of the PyTorch helper), plain-JAX glue.
# replicate pad (0,1,0,1) -> bilinear align_corners=True to (f*h+1, f*w+1)
# -> replicate pad (f//2, 0, f//2, 0) -> crop [:f*h, :f*w]
# ----------------------------------------------------------------------------
def _interp_matrix(out_size, in_size, factor, dtype):
    j = jnp.arange(out_size, dtype=jnp.float32)
    src = j / float(factor)                 # align_corners=True scale = 1/factor
    i0 = jnp.clip(jnp.floor(src).astype(jnp.int32), 0, in_size - 2)
    frac = src - i0.astype(jnp.float32)
    rows = jnp.arange(out_size)
    m = jnp.zeros((out_size, in_size), jnp.float32)
    m = m.at[rows, i0].set(1.0 - frac)
    m = m.at[rows, i0 + 1].set(frac)
    return m.astype(dtype)


def aligned_bilinear_nchw(x, factor):
    # TODO(synk): fold this upsample + residual add into the consumer conv's
    # im2col path to save one HBM round trip of the hidden feature map.
    if factor == 1:
        return x
    n, c, h, w = x.shape
    xp = jnp.pad(x, ((0, 0), (0, 0), (0, 1), (0, 1)), mode="edge")
    oh, ow = factor * h + 1, factor * w + 1
    mh = _interp_matrix(oh, h + 1, factor, x.dtype)
    mw = _interp_matrix(ow, w + 1, factor, x.dtype)
    # Two batched matmuls (W-interp then H-interp) instead of a 3-operand einsum.
    y = jnp.einsum("ncyx,bx->ncyb", xp, mw, preferred_element_type=jnp.float32)
    y = jnp.einsum("ay,ncyb->ncab", mh, y, preferred_element_type=jnp.float32)
    ph = factor // 2
    y = jnp.pad(y, ((0, 0), (0, 0), (ph, 0), (ph, 0)), mode="edge")
    return y[:, :, :oh - 1, :ow - 1].astype(x.dtype)


# ----------------------------------------------------------------------------
# MaskConvBranch forward (inputs / outputs in PyTorch NCHW layout)
# ----------------------------------------------------------------------------
def mask_conv_branch_forward(features_nchw, params, num_outputs):
    x = None
    for i in range(3):
        p = params["refine"][i]
        xi = conv3x3_ln_relu(features_nchw[i], p["w"], p["gamma"], p["beta"])
        if i == 0:
            x = xi
        else:
            th, tw = x.shape[2], x.shape[3]
            h, w = xi.shape[2], xi.shape[3]
            assert th % h == 0 and tw % w == 0
            fh, fw = th // h, tw // w
            assert fh == fw
            xi = aligned_bilinear_nchw(xi, fh)
            x = x + xi
    for p in params["tower"]:
        x = conv3x3_ln_relu(x, p["w"], p["gamma"], p["beta"])
    mask_feats = conv1x1_bias(x, params["pred_w"], params["pred_b"])
    if num_outputs == 0:
        # Matches the PyTorch reference: it only slices when num_outputs == 0.
        mask_feats = mask_feats[:, :num_outputs]
    return mask_feats


# ----------------------------------------------------------------------------
# Deterministic parameter construction (kaiming_uniform_(a=1) ~ U[-sqrt(3/fan_in), +])
# ----------------------------------------------------------------------------
def make_params(key, in_channel, hidden, num_conv, num_outputs):
    def conv_w(k, cout, cin, ksz):
        fan_in = cin * ksz * ksz
        bound = (3.0 / fan_in) ** 0.5
        return jax.random.uniform(k, (cout, cin, ksz, ksz), jnp.float32, -bound, bound)

    keys = jax.random.split(key, 3 + num_conv + 2)
    params = {"refine": [], "tower": []}
    for i in range(3):
        params["refine"].append({
            "w": conv_w(keys[i], hidden, in_channel, 3),
            "gamma": jnp.ones((hidden,), jnp.float32),
            "beta": jnp.zeros((hidden,), jnp.float32),
        })
    for i in range(num_conv):
        params["tower"].append({
            "w": conv_w(keys[3 + i], hidden, hidden, 3),
            "gamma": jnp.ones((hidden,), jnp.float32),
            "beta": jnp.zeros((hidden,), jnp.float32),
        })
    cout = max(num_outputs, 1)
    params["pred_w"] = conv_w(keys[3 + num_conv], cout, hidden, 1)
    params["pred_b"] = 0.01 * jax.random.normal(keys[4 + num_conv], (cout,), jnp.float32)
    return params


if __name__ == "__main__":
    key = jax.random.PRNGKey(0)
    N, IN_C, H, W = 2, 4, 16, 16
    HIDDEN = 32
    NUM_CONV = 4
    NUM_OUTPUTS = 8

    k_f0, k_f1, k_f2, k_p = jax.random.split(key, 4)
    # PyTorch-style NCHW feature pyramid (strides 1x, 2x, 4x relative to f0).
    f0 = jax.random.normal(k_f0, (N, IN_C, H, W), jnp.float32)
    f1 = jax.random.normal(k_f1, (N, IN_C, H // 2, W // 2), jnp.float32)
    f2 = jax.random.normal(k_f2, (N, IN_C, H // 4, W // 4), jnp.float32)

    params = make_params(k_p, IN_C, HIDDEN, NUM_CONV, NUM_OUTPUTS)

    out_nchw = mask_conv_branch_forward([f0, f1, f2], params, NUM_OUTPUTS)
    jax.block_until_ready(out_nchw)

    assert out_nchw.shape == (N, max(NUM_OUTPUTS, 1), H, W)
    assert out_nchw.dtype == jnp.float32
    print("KERNEL_OK")
</pallas_src>

<mosaic_0001>
module attributes {stable_mosaic.version = 11 : i64} {
  func.func @_matmul_ln_relu_kernel(%arg0: i32, %arg1: i32, %arg2: memref<1x36x256xbf16, #tpu.memory_space<vmem>>, %arg3: memref<32x36xbf16, #tpu.memory_space<vmem>>, %arg4: memref<32x1xf32, #tpu.memory_space<vmem>>, %arg5: memref<32x1xf32, #tpu.memory_space<vmem>>, %arg6: memref<1x32x256xbf16, #tpu.memory_space<vmem>>) attributes {dimension_semantics = [#tpu.dimension_semantics<parallel>, #tpu.dimension_semantics<parallel>], iteration_bounds = array<i64: 2, 1>, scalar_prefetch = 0 : i64, scratch_operands = 0 : i64, tpu.core_type = #tpu.core_type<tc>, window_params = [{transform_indices = @transform_0, window_bounds = array<i64: 1, 36, 256>}, {pipeline_mode = #tpu.pipeline_mode<synchronous>, transform_indices = @transform_1, window_bounds = array<i64: 32, 36>}, {pipeline_mode = #tpu.pipeline_mode<synchronous>, transform_indices = @transform_2, window_bounds = array<i64: 32, 1>}, {pipeline_mode = #tpu.pipeline_mode<synchronous>, transform_indices = @transform_3, window_bounds = array<i64: 32, 1>}, {transform_indices = @transform_4, window_bounds = array<i64: 1, 32, 256>}]} {
    %c0 = arith.constant 0 : index
    %c0_0 = arith.constant 0 : index
    %0 = vector.load %arg3[%c0, %c0_0] : memref<32x36xbf16, #tpu.memory_space<vmem>>, vector<32x36xbf16>
    %c0_1 = arith.constant 0 : index
    %c0_2 = arith.constant 0 : index
    %c0_3 = arith.constant 0 : index
    %1 = vector.load %arg2[%c0_1, %c0_2, %c0_3] : memref<1x36x256xbf16, #tpu.memory_space<vmem>>, vector<1x36x256xbf16>
    %2 = vector.shape_cast %1 : vector<1x36x256xbf16> to vector<36x256xbf16>
    %cst = arith.constant dense<0.000000e+00> : vector<32x256xf32>
    %3 = tpu.matmul %0, %2, %cst {dimension_numbers = #tpu.dot_dimension_numbers<[1], [0], [0], [1], [0, 0, 1, 1], [], []>} : vector<32x36xbf16>, vector<36x256xbf16>, vector<32x256xf32> -> vector<32x256xf32>
    %cst_4 = arith.constant dense<0.000000e+00> : vector<256xf32>
    %4 = vector.multi_reduction <add>, %3, %cst_4 [0] : vector<32x256xf32> to vector<256xf32>
    %5 = vector.shape_cast %4 : vector<256xf32> to vector<1x256xf32>
    %6 = arith.mulf %3, %3 : vector<32x256xf32>
    %cst_5 = arith.constant dense<0.000000e+00> : vector<256xf32>
    %7 = vector.multi_reduction <add>, %6, %cst_5 [0] : vector<32x256xf32> to vector<256xf32>
    %8 = vector.shape_cast %7 : vector<256xf32> to vector<1x256xf32>
    %cst_6 = arith.constant 3.125000e-02 : f32
    %9 = vector.broadcast %cst_6 : f32 to vector<1x256xf32>
    %10 = arith.mulf %5, %9 : vector<1x256xf32>
    %cst_7 = arith.constant 3.125000e-02 : f32
    %11 = vector.broadcast %cst_7 : f32 to vector<1x256xf32>
    %12 = arith.mulf %8, %11 : vector<1x256xf32>
    %13 = arith.mulf %10, %10 : vector<1x256xf32>
    %14 = arith.subf %12, %13 : vector<1x256xf32>
    %15 = vector.broadcast %10 : vector<1x256xf32> to vector<32x256xf32>
    %16 = arith.subf %3, %15 : vector<32x256xf32>
    %cst_8 = arith.constant 9.99999974E-6 : f32
    %17 = vector.broadcast %cst_8 : f32 to vector<1x256xf32>
    %18 = arith.addf %14, %17 : vector<1x256xf32>
    %19 = math.rsqrt %18 : vector<1x256xf32>
    %20 = vector.broadcast %19 : vector<1x256xf32> to vector<32x256xf32>
    %21 = arith.mulf %16, %20 : vector<32x256xf32>
    %c0_9 = arith.constant 0 : index
    %c0_10 = arith.constant 0 : index
    %22 = vector.load %arg4[%c0_9, %c0_10] : memref<32x1xf32, #tpu.memory_space<vmem>>, vector<32x1xf32>
    %23 = vector.broadcast %22 : vector<32x1xf32> to vector<32x256xf32>
    %24 = arith.mulf %21, %23 : vector<32x256xf32>
    %c0_11 = arith.constant 0 : index
    %c0_12 = arith.constant 0 : index
    %25 = vector.load %arg5[%c0_11, %c0_12] : memref<32x1xf32, #tpu.memory_space<vmem>>, vector<32x1xf32>
    %26 = vector.broadcast %25 : vector<32x1xf32> to vector<32x256xf32>
    %27 = arith.addf %24, %26 : vector<32x256xf32>
    %cst_13 = arith.constant 0.000000e+00 : f32
    %28 = vector.broadcast %cst_13 : f32 to vector<32x256xf32>
    %29 = arith.maximumf %27, %28 : vector<32x256xf32>
    %30 = arith.truncf %29 : vector<32x256xf32> to vector<32x256xbf16>
    %c0_14 = arith.constant 0 : index
    %c0_15 = arith.constant 0 : index
    %c0_16 = arith.constant 0 : index
    %31 = vector.load %arg6[%c0_14, %c0_15, %c0_16] : memref<1x32x256xbf16, #tpu.memory_space<vmem>>, vector<1x32x256xbf16>
    %32 = vector.shape_cast %31 : vector<1x32x256xbf16> to vector<32x256xbf16>
    %33 = vector.shape_cast %30 : vector<32x256xbf16> to vector<1x32x256xbf16>
    tpu.vector_store %arg6[%c0_14, %c0_15, %c0_16], %33 {strides = array<i32>} : memref<1x32x256xbf16, #tpu.memory_space<vmem>>, vector<1x32x256xbf16>,
    return
  }
  func.func @transform_0(%arg0: i32, %arg1: i32) -> (i32, i32, i32) {
    %c0_i32 = arith.constant 0 : i32
    %c0_i32_0 = arith.constant 0 : i32
    return %arg0, %c0_i32, %arg1 : i32, i32, i32
  }
  func.func @transform_1(%arg0: i32, %arg1: i32) -> (i32, i32) {
    %c0_i32 = arith.constant 0 : i32
    %c0_i32_0 = arith.constant 0 : i32
    %c0_i32_1 = arith.constant 0 : i32
    return %c0_i32, %c0_i32_0 : i32, i32
  }
  func.func @transform_2(%arg0: i32, %arg1: i32) -> (i32, i32) {
    %c0_i32 = arith.constant 0 : i32
    %c0_i32_0 = arith.constant 0 : i32
    %c0_i32_1 = arith.constant 0 : i32
    return %c0_i32, %c0_i32_0 : i32, i32
  }
  func.func @transform_3(%arg0: i32, %arg1: i32) -> (i32, i32) {
    %c0_i32 = arith.constant 0 : i32
    %c0_i32_0 = arith.constant 0 : i32
    %c0_i32_1 = arith.constant 0 : i32
    return %c0_i32, %c0_i32_0 : i32, i32
  }
  func.func @transform_4(%arg0: i32, %arg1: i32) -> (i32, i32, i32) {
    %c0_i32 = arith.constant 0 : i32
    %c0_i32_0 = arith.constant 0 : i32
    return %arg0, %c0_i32, %arg1 : i32, i32, i32
  }
}

</mosaic_0001>

<bundles_post_ra>
// kernel: tpu_custom_call.1
= control target key start
LH: loop header
LB: loop body
LE: loop exit
PB: predicated region body
PF: predicated region fallthrough
CT: control target
= control target key end

     0   :  { %9 = vsyncpa [#allocation3], 0  ;;  %s1025_s0 = inlined_call_operand.vmem [shape: bf16[2,36,256], index: 0, kind: input, shape index: {}]   ;;  %s1026_s1 = inlined_call_operand.vmem [shape: bf16[32,36], index: 1, kind: input, shape index: {}]   ;;  %s1027_s2 = inlined_call_operand.vmem [shape: f32[32,1], index: 2, kind: input, shape index: {}]   ;;  %s1028_s3 = inlined_call_operand.vmem [shape: f32[32,1], index: 3, kind: input, shape index: {}]   ;;  %s1029_s4 = inlined_call_operand.hbm [shape: bf16[2,32,256], index: 4, kind: output, shape index: {}]  }
   0x1   :  { %11 = vsyncpa [#allocation3 + $0x1], 0  ;;  %s828_s15 = smov 0   ;;  %s830_s16 = smov 0  }
   0x2   :  { %s832_s17 = smov 0   ;;  %s834_s18 = smov 0  }
   0x3   :  { %s836_s19 = smov 0   ;;  %s838_s20 = smov 0  }
   0x4 LB: > { %s606_s21 = sadd.s32 4294967295, %s797_s20   ;;  %s607_s22 = sadd.s32 4294967294, %s797_s20   ;;  %s797_s20 = sphi %s838_s20, %s17_s20   ;;  %s793_s19 = sphi %s836_s19, %s1036_s19   ;;  %s789_s18 = sphi %s834_s18, %s1035_s18   ;;  %s785_s17 = sphi %s832_s17, %s1034_s17   ;;  %s781_s16 = sphi %s830_s16, %s1033_s16   ;;  %s777_s15 = sphi %s828_s15, %s1032_s15  }
   0x5   : > { %s29_s23 = sadd.s32 1, %s793_s19  ;;  %s129_s24 = sadd.s32 1, %s785_s17 }
   0x6   : > { %p31_p0 = scmp.ge.s32.totalorder %s29_s23, 2  ;;  %p139_p1 = scmp.ne.s32.totalorder %s785_s17, %s781_s16 }
   0x7   : > { %p140_p2 = scmp.eq.s32.totalorder %s606_s21, 1  ;;  %p145_p3 = scmp.ne.s32.totalorder %s781_s16, %s777_s15 }
   0x8   : > { %s1038_s23 = smov (%p31_p0, %s29_s23), 0  ;;  %p146_p5 = scmp.eq.s32.totalorder %s607_s22, 1 }
   0x9   : > { %p868_p4 = por %p140_p2, %p139_p1  ;;  %s124_s26 = ssub.s32 %s793_s19, %s1038_s23 }
   0xa   : > { %p610_p6 = scmp.ge.s32.totalorder %s797_s20, 1  ;;  %p127_p7 = scmp.eq.s32.totalorder %s124_s26, 0 }
   0xb   : > { %p875_p8 = por %p146_p5, %p145_p3  ;;  %p186_p9 = scmp.lt.s32.totalorder %s797_s20, 3 }
   0xc   : > { %s881_s28 = scalar_select %p127_p7, %s785_s17, %s129_s24  }
   0xd   : > { %p187_p10 = pnand %p610_p6, %p186_p9 }
   0xe   : > { %p217_p11 = scmp.lt.s32.totalorder (!%p187_p10), %s789_s18, 1  ;;  %v799_v0 = vmov (!%p187_p10), 0   ;;  %v413_v1 = vld [vmem:[%s1027_s2 + $0x10] sm:$0xff] (!%p187_p10)  ;;  %v411_v2 = vld [vmem:[%s1027_s2] sm:$0xff] (!%p187_p10)  ;;  %v414_v3 = vld [vmem:[%s1027_s2 + $0x18] sm:$0xff] (!%p187_p10)  ;;  %vm279_vm0 = vcmask (!%p187_p10), 1041408  }
   0xf   : > { %190 = sbr.rel (%p187_p10) target bundleno = 318 (0x13e), region = 36  ;;  %318 = vmatprep.mubr.bf16.mxu0 (!%p187_p10), %v799_v0  ;;  %328 = vmatprep.mubr.bf16.mxu1 (!%p187_p10), %v799_v0  ;;  %v412_v4 = vld [vmem:[%s1027_s2 + $0x8] sm:$0xff] (!%p187_p10)  ;;  %v443_v10 = vld [vmem:[%s1028_s3] sm:$0xff] (!%p187_p10)  ;;  %v446_v14 = vld [vmem:[%s1028_s3 + $0x18] sm:$0xff] (!%p187_p10)  ;;  %vm272_vm1 = vcmask (!%p187_p10), 293888   ;;  %s213_s12 = sand.u32 (!%p187_p10), 1, %s781_s16  }
  0x10   : > { %704 = vset.pattern.permute.xlu1 (!%p187_p10), %v799_v0  ;;  %703 = vset.pattern.permute.xlu0 (!%p187_p10), %v799_v0  ;;  %v444_v6 = vld [vmem:[%s1028_s3 + $0x8] sm:$0xff] (!%p187_p10)  ;;  %v445_v15 = vld [vmem:[%s1028_s3 + $0x10] sm:$0xff] (!%p187_p10)  ;;  %v713_v17 = vld [vmem:[%s1026_s1] sm:$0xff] (!%p187_p10)   ;;  %s611_s13 = sshll.u32 (!%p187_p10), %s213_s12, 5  ;;  %s637_s22 = sshll.u32 (!%p187_p10), %s789_s18, 9 }
  0x11   : > { %427 = vperm.xlu1 (!%p187_p10), %704, %v413_v1   ;;  %417 = vperm.xlu0 (!%p187_p10), %703, %v411_v2   ;;  %v714_v18 = vld [vmem:[%s1026_s1 + $0x8] sm:$0xff] (!%p187_p10)   ;;  %s215_s14 = scalar_lea.vmem (!%p187_p10), [#allocation2], %s611_s13  ;;  %s800_s5 = smov (!%p187_p10), [#allocation2]  }
  0x12   : > { %s723_s6 = sshll.u32 (!%p187_p10), %s800_s5, 4  ;;  %s724_s6 = int_to_ptr.vmem [resolvable:$false] %s723_s6 }
  0x13   : > { %s725_s7 = scalar_lea.vmem (!%p187_p10), %s724_s6, 1024 }
  0x15   : > { %432 = vperm.xlu1 (!%p187_p10), %704, %v414_v3   ;;  %422 = vperm.xlu0 (!%p187_p10), %703, %v412_v4  }
  0x16   : > { %s218_s29 = scalar_select %p217_p11, %s789_s18, 1 }
  0x17   : > { %s979_s18 = scalar_lea.sflag [#allocation3], %s213_s12 }
  0x18   : > { %s644_s8 = smul.u32 40, %s218_s29  ;;  %s975_s29 = scalar_lea.hbm %s1029_s4, %s637_s22 }
  0x19   : > { %454 = vperm.xlu1 %704, %v444_v6   ;;  %449 = vperm.xlu0 %703, %v443_v10  }
  0x1a   : > { %s224_s21 = scalar_lea.vmem %s1025_s0, %s644_s8 }
  0x1b   : > { %v705_v5 = vld [vmem:[%s224_s21 + $0x4] ss:$8 sps:$4 sm:$0xff]   ;;  %v707_v7 = vld [vmem:[%s224_s21] ss:$8 sps:$4 sm:$0xff]   ;;  %v708_v8 = vld [vmem:[%s224_s21 + $0x14] ss:$8 sps:$4 sm:$0xff]  }
  0x1c   : > { %286 = vmatprep.subr.bf16.mxu0 %v705_v5  ;;  %638 = vmatprep.subr.bf16.mxu1 %v705_v5  ;;  %v236_v9 = vld [vmem:[%s224_s21 + $0x20] sm:$0x33]  ;;  %v710_v11 = vld [vmem:[%s224_s21 + $0x10] ss:$8 sps:$4 sm:$0xff]   ;;  %s527_s21 = sshll.u32 %s215_s14, 4  ;;  %s970_s21 = int_to_ptr.vmem [resolvable:$true] %s527_s21 }
  0x1d   : > { %287 = vmatpush1.bf16.msra.mxu0 %v707_v7  ;;  %641 = vmatpush1.bf16.msra.mxu1 %v707_v7  ;;  %v620_v12 = vcombine.high %v236_v9, %v236_v9  ;;  %v619_v13 = vcombine.low %v236_v9, %v236_v9  ;;  %s719_s30 = scalar_lea.vmem %s970_s21, 512  ;;  %p726_p1 = scmp.lt.s32.totalorder %s970_s21, %s724_s6 }
  0x1e   : > { %288 = vmatprep.subr.bf16.mxu0 %v708_v8  ;;  %639 = vmatprep.subr.bf16.mxu1 %v708_v8  ;;  %p720_p12 = scmp.ne.s32.totalorder %s970_s21, %s719_s30  ;;  %p727_p2 = scmp.lt.s32.totalorder %s725_s7, %s719_s30 }
  0x1f   : > { %v281_v16 = vsel %vm279_vm0, %v619_v13, 0  ;;  %464 = vperm.xlu1 %704, %v446_v14   ;;  %459 = vperm.xlu0 %703, %v445_v15  }
  0x20   : > { %p721_p13 = pnand %p720_p12, %p868_p4  ;;  %p728_p3 = por %p727_p2, %p726_p1 }
  0x21   : > { %289 = vmatpush1.bf16.msra.mxu0 %v710_v11  ;;  %642 = vmatpush1.bf16.msra.mxu1 %v710_v11 }
  0x22   : > { %621 = vmatprep.subr.msk.bf16.mxu0 %vm279_vm0, %v620_v12  ;;  %640 = vmatprep.subr.msk.bf16.mxu1 %vm279_vm0, %v620_v12  ;;  %p722_p0 = pneg %p721_p13 }
  0x24   : > { %p729_p5 = pnand %p728_p3, %p722_p0 }
  0x25   : > { %291 = vmatpush1.bf16.msra.mxu0 %v281_v16  ;;  %643 = vmatpush1.bf16.msra.mxu1 %v281_v16 }
  0x28   : > { %622 = vmatmul.mubr.msk.bf16.vlgmr.msra.gmra.mrb[0].mxu0 %vm272_vm1, %v713_v17  ;;  %623 = vmatmul.mubr.msk.bf16.vlgmr.msra.gmra.mrb[0].mxu1 %vm272_vm1, %v714_v18 }
  0x90   : > { %v428_v18 = vpop.permute.xlu1 %427 }
  0xfb   : > { %v918_v19 = vpop.f32.mrb[0].mxu0  ;;  %v920_v20 = vpop.f32.mrb[0].mxu1 }
  0xfc   : > { %v922_v21 = vpop.f32.mrb[1].mxu0  ;;  %v924_v22 = vpop.f32.mrb[1].mxu1  ;;  %v357_v25 = vmul.f32 %v918_v19, %v918_v19  ;;  %v361_v26 = vmul.f32 %v920_v20, %v920_v20 }
  0xfd   : > { %v926_v23 = vpop.f32.mrb[2].mxu0  ;;  %v928_v24 = vpop.f32.mrb[2].mxu1  ;;  %v358_v31 = vmul.f32 %v922_v21, %v922_v21  ;;  %v362_v32 = vmul.f32 %v924_v22, %v924_v22 }
  0xfe   : > { %v339_v27 = vadd.f32 %v926_v23, %v918_v19  ;;  %v359_v28 = vmul.f32 %v926_v23, %v926_v23  ;;  %v938_v29 = vpop.f32.mrb[3].mxu0  ;;  %v940_v30 = vpop.f32.mrb[3].mxu1  ;;  %v363_v40 = vmul.f32 %v928_v24, %v928_v24 }
  0xff   : > { %v348_v33 = vadd.f32 %v938_v29, %v922_v21  ;;  %v360_v34 = vmul.f32 %v938_v29, %v938_v29  ;;  %v364_v43 = vmul.f32 %v940_v30, %v940_v30 }
 0x100   : > { %v365_v35 = vadd.f32 %v359_v28, %v357_v25  ;;  %v340_v36 = vadd.f32 %v339_v27, %v920_v20  ;;  %v418_v25 = vpop.permute.xlu0 %417 }
 0x101   : > { %v374_v37 = vadd.f32 %v360_v34, %v358_v31  ;;  %v349_v38 = vadd.f32 %v348_v33, %v924_v22 }
 0x102   : > { %v341_v39 = vadd.f32 %v340_v36, %v928_v24  ;;  %v366_v41 = vadd.f32 %v365_v35, %v361_v26 }
 0x103   : > { %v350_v42 = vadd.f32 %v349_v38, %v940_v30  ;;  %v375_v44 = vadd.f32 %v374_v37, %v362_v32 }
 0x104   : > { %v342_v45 = vrot.slane %v341_v39, 4  ;;  %v367_v46 = vadd.f32 %v366_v41, %v363_v40  ;;  %v423_v33 = vpop.permute.xlu0 %422 }
 0x105   : > { %v351_v47 = vrot.slane %v350_v42, 4  ;;  %v376_v48 = vadd.f32 %v375_v44, %v364_v43 }
 0x106   : > { %v343_v49 = vadd.f32 %v342_v45, %v341_v39  ;;  %v368_v50 = vrot.slane %v367_v46, 4 }
 0x107   : > { %v352_v51 = vadd.f32 %v351_v47, %v350_v42  ;;  %v377_v52 = vrot.slane %v376_v48, 4 }
 0x108   : > { %v344_v53 = vrot.slane %v343_v49, 2  ;;  %v369_v54 = vadd.f32 %v368_v50, %v367_v46  ;;  %v450_v34 = vpop.permute.xlu0 %449 }
 0x109   : > { %v353_v55 = vrot.slane %v352_v51, 2  ;;  %v378_v56 = vadd.f32 %v377_v52, %v376_v48 }
 0x10a   : > { %v345_v57 = vadd.f32 %v344_v53, %v343_v49  ;;  %v370_v58 = vrot.slane %v369_v54, 2 }
 0x10b   : > { %v354_v59 = vadd.f32 %v353_v55, %v352_v51  ;;  %v379_v60 = vrot.slane %v378_v56, 2 }
 0x10c   : > { %v346_v61 = vrot.slane %v345_v57, 1  ;;  %v371_v62 = vadd.f32 %v370_v58, %v369_v54  ;;  %v460_v50 = vpop.permute.xlu0 %459 }
 0x10d   : > { %v355_v63 = vrot.slane %v354_v59, 1  ;;  %v380_v0 = vadd.f32 %v379_v60, %v378_v56 }
 0x10e   : > { %v347_v1 = vadd.f32 %v346_v61, %v345_v57  ;;  %v372_v2 = vrot.slane %v371_v62, 1 }
 0x10f   : > { %v356_v3 = vadd.f32 %v355_v63, %v354_v59  ;;  %v381_v4 = vrot.slane %v380_v0, 1 }
 0x110   : > { %v373_v5 = vadd.f32 %v372_v2, %v371_v62  ;;  %v383_v6 = vmul.f32 0.03125, %v347_v1 }
 0x111   : > { %v382_v7 = vadd.f32 %v381_v4, %v380_v0  ;;  %v384_v8 = vmul.f32 0.03125, %v356_v3 }
 0x112   : > { %v385_v9 = vmul.f32 0.03125, %v373_v5  ;;  %v387_v10 = vmul.f32 %v383_v6, %v383_v6  ;;  %v397_v11 = vsub.f32 %v928_v24, %v383_v6  ;;  %v395_v12 = vsub.f32 %v920_v20, %v383_v6 }
 0x113   : > { %v386_v13 = vmul.f32 0.03125, %v382_v7  ;;  %v388_v14 = vmul.f32 %v384_v8, %v384_v8  ;;  %v398_v15 = vsub.f32 %v940_v30, %v384_v8  ;;  %v396_v16 = vsub.f32 %v924_v22, %v384_v8  ;;  %v433_v30 = vpop.permute.xlu1 %432 }
 0x114   : > { %v389_v17 = vsub.f32 %v385_v9, %v387_v10  ;;  %v391_v26 = vsub.f32 %v918_v19, %v383_v6  ;;  %v392_v27 = vsub.f32 %v922_v21, %v384_v8  ;;  %v393_v28 = vsub.f32 %v926_v23, %v383_v6 }
 0x115   : > { %v390_v24 = vsub.f32 %v386_v13, %v388_v14  ;;  %v394_v20 = vsub.f32 %v938_v29, %v384_v8 }
 0x116   : > { %v399_v31 = vadd.f32 1e-05, %v389_v17 }
 0x117   : > { %v400_v32 = vadd.f32 1e-05, %v390_v24  ;;  %v455_v22 = vpop.permute.xlu1 %454 }
 0x118   : > { %715 = vrsqrt.f32 %v399_v31 }
 0x119   : > { %717 = vrsqrt.f32 %v400_v32 }
 0x11b   : > { %v465_v49 = vpop.permute.xlu1 %464 }
 0x122   : > { %v716_v35 = vpop.eup %715 }
 0x123   : > { %v718_v19 = vpop.eup %717  ;;  %v407_v36 = vmul.f32 %v716_v35, %v395_v12  ;;  %v403_v21 = vmul.f32 %v716_v35, %v391_v26  ;;  %v409_v37 = vmul.f32 %v716_v35, %v397_v11  ;;  %v405_v23 = vmul.f32 %v716_v35, %v393_v28 }
 0x124   : > { %v408_v38 = vmul.f32 %v718_v19, %v396_v16  ;;  %v404_v39 = vmul.f32 %v718_v19, %v392_v27  ;;  %v410_v29 = vmul.f32 %v718_v19, %v398_v15  ;;  %v406_v40 = vmul.f32 %v718_v19, %v394_v20 }
 0x125   : > { %v439_v41 = vmul.f32 %v428_v18, %v407_v36  ;;  %v435_v42 = vmul.f32 %v418_v25, %v403_v21  ;;  %v441_v43 = vmul.f32 %v433_v30, %v409_v37  ;;  %v437_v44 = vmul.f32 %v423_v33, %v405_v23 }
 0x126   : > { %v440_v45 = vmul.f32 %v428_v18, %v408_v38  ;;  %v436_v46 = vmul.f32 %v418_v25, %v404_v39  ;;  %v442_v47 = vmul.f32 %v433_v30, %v410_v29  ;;  %v438_v48 = vmul.f32 %v423_v33, %v406_v40 }
 0x127   : > { %v469_v51 = vadd.f32 %v455_v22, %v437_v44  ;;  %v467_v52 = vadd.f32 %v450_v34, %v435_v42  ;;  %v473_v53 = vadd.f32 %v465_v49, %v441_v43  ;;  %v471_v54 = vadd.f32 %v460_v50, %v439_v41 }
 0x128   : > { %v470_v55 = vadd.f32 %v455_v22, %v438_v48  ;;  %v468_v56 = vadd.f32 %v450_v34, %v436_v46  ;;  %v474_v57 = vadd.f32 %v465_v49, %v442_v47  ;;  %v472_v58 = vadd.f32 %v460_v50, %v440_v45 }
 0x129   : > { %v477_v59 = vmax.f32 %v469_v51, 0.0  ;;  %v475_v60 = vmax.f32 %v467_v52, 0.0  ;;  %v481_v61 = vmax.f32 %v473_v53, 0.0  ;;  %v479_v62 = vmax.f32 %v471_v54, 0.0 }
 0x12a   : > { %v478_v63 = vmax.f32 %v470_v55, 0.0  ;;  %v476_v0 = vmax.f32 %v468_v56, 0.0  ;;  %v482_v1 = vmax.f32 %v474_v57, 0.0  ;;  %v480_v2 = vmax.f32 %v472_v58, 0.0 }
 0x12c   : > { %v634_v3 = vpack.c.bf16 %v478_v63, %v477_v59  ;;  %v633_v4 = vpack.c.bf16 %v476_v0, %v475_v60  ;;  %v636_v5 = vpack.c.bf16 %v482_v1, %v481_v61  ;;  %v635_v6 = vpack.c.bf16 %v480_v2, %v479_v62 }
 0x12e   : > { %508 = vst [vmem:[%s215_s14 + $0x8] sm:$0xff] %v634_v3  ;;  %507 = vst [vmem:[%s215_s14] sm:$0xff] %v633_v4 }
 0x12f   : > { %510 = vst [vmem:[%s215_s14 + $0x18] sm:$0xff] %v636_v5  ;;  %509 = vst [vmem:[%s215_s14 + $0x10] sm:$0xff] %v635_v6 }
 0x130   : > { %732 = shalt.err (!%p729_p5)
}
 0x131   : > { %s733_s8 = scalar_lea.hbm %s975_s29, 512  ;;  %s737_s11 = scalar_lea.hbm %s1029_s4, 1024 }
 0x132   : > { %p734_p6 = scmp.ne.s32.totalorder %s975_s29, %s733_s8  ;;  %p738_p10 = scmp.lt.u32.totalorder %s975_s29, %s1029_s4 }
 0x133   : > { %p739_p11 = scmp.lt.u32.totalorder %s737_s11, %s733_s8  ;;  %p741_p13 = scmp.lt.u32.totalorder %s733_s8, %s975_s29 }
 0x134   : > { %p735_p7 = pnand %p734_p6, %p868_p4 }
 0x135   : > { %p740_p12 = por %p739_p11, %p738_p10 }
 0x136   : > { %p736_p9 = pneg %p735_p7 }
 0x137   : > { %p742_p0 = por %p741_p13, %p740_p12 }
 0x139   : > { %p743_p1 = pnand %p742_p0, %p736_p9 }
 0x13b   : > { %746 = shalt.err (!%p743_p1)
}
 0x13c   : > { %s801_s14 = smov 128   ;;  %s802_s22 = smov 8  }
 0x13d   : > { %645 = dma.vmem_to_hbm [thread:$0]  (%p868_p4), %s970_s21, 512, %s975_s29, %s979_s18, %s801_s14, %s801_s14, %s802_s22  }
 0x13e PF: > { %p651_p2 = scmp.ge.s32.totalorder %s797_s20, 2  ;;  %s542_s24 = sand.u32 1, %s777_s15  }
 0x13f   : > { %s543_s26 = scalar_lea.sflag [#allocation3], %s542_s24 }
 0x140   : > { %p648_p3 = pnand %p651_p2, %p875_p8 }
 0x142   : > { %772 = dma.done.wait (!%p648_p3), %s543_s26, 512  }
 0x143   : > { %774 = vsyncadd (!%p648_p3), %s543_s26, 4294966784  ;;  %s17_s20 = sadd.s32 1, %s797_s20   ;;  %s1032_s15 = smov %s781_s16 }
 0x144   : > { %p14_p5 = scmp.ge.s32.totalorder %s17_s20, 4   ;;  %s1033_s16 = smov %s785_s17 }
 0x145   : > { %s1034_s17 = smov %s881_s28  ;;  %s1035_s18 = smov %s793_s19 }
 0x146   : > { %s1036_s19 = smov %s1038_s23  ;;  %16 = sbr.rel (!%p14_p5) target bundleno = 4 (0x4), region = 71 }
 0x14d   :  { %548 = vsyncpa [#allocation3], 1 }
 0x14e   :  { %550 = vsyncpa [#allocation3 + $0x1], 1 }

</bundles_post_ra>
